<compile_context>
chip_gen: v7x
topology: tpu7x:2x2x1
jax: 0.10.0
libtpu: 0.0.40
codegen_flags: <defaults>
</compile_context>

<pallas_src>
import jax
import jax.numpy as jnp
import numpy as np
from jax import lax
from jax.experimental import pallas as pl
from jax.experimental.pallas import tpu as pltpu


def _make_kernel(K, stride, padding, H, W, H_out, W_out, C_in, C_out, B_blk):
    WC = W * C_in
    WoCo = W_out * C_out

    def kernel(x_ref, a_ref, t_ref, shift_ref, o_ref, xpad_ref):
        # x_ref: (B_blk, H, W*C_in) lane-dense activations for B_blk batch elements.
        x = x_ref[...]
        a = a_ref[...]                                  # (1, W*C_in) tiled PReLU slopes

        # PReLU in the input dtype (PReLU(0) == 0, so it commutes with zero padding).
        xp = jnp.where(x > 0, x, x * a)

        # H-only pad scratch: zero just the halo rows; the interior is fully overwritten
        # every grid step.  Do NOT convert this to a once-only @pl.when under "parallel"
        # batch semantics (second TensorCore's scratch would never be initialized).
        if padding > 0:
            zeros_halo = jnp.zeros((B_blk, padding, WC), xpad_ref.dtype)
            xpad_ref[:, :padding, :] = zeros_halo
            xpad_ref[:, padding + H:, :] = zeros_halo
        xpad_ref[:, padding:padding + H, :] = xp

        # K MXU matmuls against banded merged weights (dw * pw * bn_scale with W-padding
        # folded in as zero columns), accumulated in f32.  Accumulator is lane-dense.
        acc = jnp.zeros((B_blk * H_out, WoCo), jnp.float32)
        for kh in range(K):
            if stride == 1:
                rows = xpad_ref[:, kh:kh + H_out, :]
            else:
                # TODO(synk): stride>1 takes a strided sublane read; if this path gets
                # hot, decompose the stride via an (H_out, stride, ...) reshape instead.
                rows = xpad_ref[:, pl.ds(kh, H_out, stride), :]
            acc = acc + jnp.dot(rows.reshape(B_blk * H_out, WC), t_ref[kh],
                                preferred_element_type=jnp.float32)

        # BatchNorm shift (per-channel scale is already folded into the weights).
        y = acc + shift_ref[...]
        o_ref[...] = y.reshape(B_blk, H_out, WoCo).astype(o_ref.dtype)

    return kernel


def _pick_b_blk(N, per_image_bytes, budget=4 << 20):
    """Largest divisor of N that keeps >= 2 grid steps (megacore) and small blocks."""
    if N <= 1:
        return 1
    for b in range(N // 2, 0, -1):
        if N % b == 0 and b * per_image_bytes <= budget:
            return b
    return 1


def std_conv(x_nchw, params, *, kernel_size, stride, padding):
    """Pallas implementation of StdConv.forward. Input/output are NCHW (PyTorch)."""
    prelu_a, dw_w, pw_w, gamma, beta, run_mean, run_var, eps = params
    N, C_in, H, W = x_nchw.shape
    C_out = pw_w.shape[0]
    K = kernel_size

    Hp = H + 2 * padding
    H_out = (H + 2 * padding - K) // stride + 1
    W_out = (W + 2 * padding - K) // stride + 1
    WC = W * C_in
    WoCo = W_out * C_out

    itemsize = x_nchw.dtype.itemsize
    compute_dtype = jnp.bfloat16 if x_nchw.dtype == jnp.bfloat16 else jnp.float32

    # Lane-dense activation repack: (N, C, H, W) -> (N, H, W*C_in).
    # TODO(synk): the NCHW <-> lane-dense repack is still an XLA transpose in the wrapper;
    # fusing it into the kernel would save one more HBM round trip per tensor.
    x2d = jnp.transpose(x_nchw, (0, 2, 3, 1)).reshape(N, H, WC)

    # ---- Parameter folding (runs once, tiny) ------------------------------------------
    a_row = jnp.tile(prelu_a, W).reshape(1, WC).astype(x_nchw.dtype)
    inv_std = 1.0 / jnp.sqrt(run_var + eps)
    bn_scale = (gamma * inv_std).astype(jnp.float32)                         # (C_out,)
    shift_row = jnp.tile((beta - run_mean * gamma * inv_std).astype(jnp.float32),
                         W_out).reshape(1, WoCo)
    # merged[kh, kw, ci, co] = dw[ci, kh, kw] * pw[co, ci] * bn_scale[co]
    # (both convs have bias=False in the module, so there are no bias terms to fold).
    dw_k = jnp.transpose(dw_w[:, 0], (1, 2, 0)).astype(jnp.float32)          # (K, K, C_in)
    pw = jnp.transpose(pw_w[:, :, 0, 0], (1, 0)).astype(jnp.float32)         # (C_in, C_out)
    merged = dw_k[..., None] * pw[None, None] * bn_scale[None, None, None, :]

    # Banded ("Toeplitz") weights with W-direction zero padding folded in:
    # T[kh, wi*C_in+ci, wo*C_out+co] = merged[kh,kw,ci,co]  iff  wi == wo*stride+kw-padding.
    sel = np.zeros((K, W, W_out), np.float32)
    for kw in range(K):
        for wo in range(W_out):
            wi = wo * stride + kw - padding
            if 0 <= wi < W:
                sel[kw, wi, wo] = 1.0
    T = jnp.einsum("kwv,hkio->hwivo", jnp.asarray(sel), merged)
    T = T.reshape(K, WC, WoCo).astype(compute_dtype)

    # TODO(synk): BatchNorm uses inference (running-stats) semantics; PyTorch's default
    # train-mode batch statistics would need a cross-batch reduction pass.

    # ---- Grid / block selection --------------------------------------------------------
    per_image_bytes = (H * WC + H_out * WoCo) * itemsize
    B_blk = _pick_b_blk(N, per_image_bytes)
    grid = (N // B_blk,)

    kernel = _make_kernel(K, stride, padding, H, W, H_out, W_out, C_in, C_out, B_blk)

    # Explicit VMEM budget (v7x only has 64 MiB physical); generous margin over estimate.
    est = (2 * B_blk * (H * WC + H_out * WoCo) * itemsize
           + 2 * K * WC * WoCo * jnp.dtype(compute_dtype).itemsize
           + B_blk * Hp * WC * itemsize
           + 2 * (WC + WoCo) * 4)
    vmem_limit = int(min(48 << 20, max(8 << 20, 8 * est)))

    cost = pl.CostEstimate(
        flops=2 * N * H_out * K * WC * WoCo + 4 * N * H * WC,
        transcendentals=0,
        bytes_accessed=(x2d.size + N * H_out * WoCo) * itemsize
        + T.size * jnp.dtype(compute_dtype).itemsize
        + (a_row.size + shift_row.size) * 4)

    out = pl.pallas_call(
        kernel,
        out_shape=jax.ShapeDtypeStruct((N, H_out, WoCo), x_nchw.dtype),
        grid_spec=pltpu.PrefetchScalarGridSpec(
            num_scalar_prefetch=0,
            grid=grid,
            in_specs=[
                pl.BlockSpec((B_blk, H, WC), lambda n: (n, 0, 0)),
                pl.BlockSpec((1, WC), lambda n: (0, 0)),
                pl.BlockSpec((K, WC, WoCo), lambda n: (0, 0, 0)),
                pl.BlockSpec((1, WoCo), lambda n: (0, 0)),
            ],
            out_specs=pl.BlockSpec((B_blk, H_out, WoCo), lambda n: (n, 0, 0)),
            scratch_shapes=[pltpu.VMEM((B_blk, Hp, WC), x_nchw.dtype)],
        ),
        compiler_params=pltpu.CompilerParams(
            dimension_semantics=("parallel",),
            vmem_limit_bytes=vmem_limit),
        cost_estimate=cost,
    )(x2d, a_row, T, shift_row)
    # TODO(synk): if W_out*C_out is not a multiple of 128 for other shapes, pad C_out (or
    # tile W_out) in the out spec so the final stores stay unmasked; for large H on v7x,
    # additionally tile H_out with a halo'd index_map.

    out = out.reshape(N, H_out, W_out, C_out)
    return jnp.transpose(out, (0, 3, 1, 2))


def std_conv_ref(x, params, *, kernel_size, stride, padding):
    """Pure-JAX reference mirroring the PyTorch module (BN in eval mode)."""
    prelu_a, dw_w, pw_w, gamma, beta, run_mean, run_var, eps = params
    C_in = x.shape[1]
    xp = jnp.where(x > 0, x, prelu_a[None, :, None, None] * x)
    y = lax.conv_general_dilated(
        xp, dw_w, (stride, stride), [(padding, padding), (padding, padding)],
        feature_group_count=C_in, dimension_numbers=("NCHW", "OIHW", "NCHW"))
    y = lax.conv_general_dilated(
        y, pw_w, (1, 1), [(0, 0), (0, 0)],
        dimension_numbers=("NCHW", "OIHW", "NCHW"))
    inv = (1.0 / jnp.sqrt(run_var + eps))[None, :, None, None]
    return (y - run_mean[None, :, None, None]) * inv * gamma[None, :, None, None] \
        + beta[None, :, None, None]


if __name__ == "__main__":
    key = jax.random.PRNGKey(0)
    N, C_in, H, W = 2, 4, 16, 16
    C_out, K, stride, padding = 8, 3, 1, 1

    ks = jax.random.split(key, 8)
    x = jax.random.normal(ks[0], (N, C_in, H, W), jnp.float32)

    # Deterministic synthetic parameters (shapes match the PyTorch module's __init__).
    prelu_a = jnp.full((C_in,), 0.25, jnp.float32) + 0.05 * jax.random.normal(ks[1], (C_in,), jnp.float32)
    dw_w = 0.2 * jax.random.normal(ks[2], (C_in, 1, K, K), jnp.float32)      # Conv2d(C_in, C_in, K, groups=C_in, bias=False)
    pw_w = 0.2 * jax.random.normal(ks[3], (C_out, C_in, 1, 1), jnp.float32)  # Conv2d(C_in, C_out, 1, bias=False)
    gamma = 1.0 + 0.1 * jax.random.normal(ks[4], (C_out,), jnp.float32)
    beta = 0.1 * jax.random.normal(ks[5], (C_out,), jnp.float32)
    run_mean = 0.1 * jax.random.normal(ks[6], (C_out,), jnp.float32)
    run_var = jnp.abs(jax.random.normal(ks[7], (C_out,), jnp.float32)) + 0.5
    eps = 1e-5
    params = (prelu_a, dw_w, pw_w, gamma, beta, run_mean, run_var, eps)

    out = std_conv(x, params, kernel_size=K, stride=stride, padding=padding)
    out = jax.block_until_ready(out)

    ref = std_conv_ref(x, params, kernel_size=K, stride=stride, padding=padding)
    assert out.shape == (N, C_out, H, W), out.shape
    assert jnp.allclose(out, ref, atol=1e-4, rtol=1e-4), float(jnp.max(jnp.abs(out - ref)))
    print("KERNEL_OK")
</pallas_src>

<mosaic_0001>
module attributes {stable_mosaic.version = 11 : i64} {
  func.func @kernel(%arg0: i32, %arg1: memref<1x16x64xf32, #tpu.memory_space<vmem>>, %arg2: memref<1x64xf32, #tpu.memory_space<vmem>>, %arg3: memref<3x64x128xf32, #tpu.memory_space<vmem>>, %arg4: memref<1x128xf32, #tpu.memory_space<vmem>>, %arg5: memref<1x16x128xf32, #tpu.memory_space<vmem>>, %arg6: memref<1x18x64xf32, #tpu.memory_space<vmem>>) attributes {dimension_semantics = [#tpu.dimension_semantics<parallel>], iteration_bounds = array<i64: 2>, scalar_prefetch = 0 : i64, scratch_operands = 1 : i64, tpu.core_type = #tpu.core_type<tc>, window_params = [{transform_indices = @transform_0, window_bounds = array<i64: 1, 16, 64>}, {pipeline_mode = #tpu.pipeline_mode<synchronous>, transform_indices = @transform_1, window_bounds = array<i64: 1, 64>}, {pipeline_mode = #tpu.pipeline_mode<synchronous>, transform_indices = @transform_2, window_bounds = array<i64: 3, 64, 128>}, {pipeline_mode = #tpu.pipeline_mode<synchronous>, transform_indices = @transform_3, window_bounds = array<i64: 1, 128>}, {transform_indices = @transform_4, window_bounds = array<i64: 1, 16, 128>}]} {
    %c0 = arith.constant 0 : index
    %c0_0 = arith.constant 0 : index
    %c0_1 = arith.constant 0 : index
    %0 = vector.load %arg1[%c0, %c0_0, %c0_1] : memref<1x16x64xf32, #tpu.memory_space<vmem>>, vector<1x16x64xf32>
    %c0_2 = arith.constant 0 : index
    %c0_3 = arith.constant 0 : index
    %1 = vector.load %arg2[%c0_2, %c0_3] : memref<1x64xf32, #tpu.memory_space<vmem>>, vector<1x64xf32>
    %cst = arith.constant 0.000000e+00 : f32
    %2 = vector.broadcast %cst : f32 to vector<1x16x64xf32>
    %3 = arith.cmpf ogt, %0, %2 : vector<1x16x64xf32>
    %4 = vector.shape_cast %1 : vector<1x64xf32> to vector<1x1x64xf32>
    %5 = vector.broadcast %4 : vector<1x1x64xf32> to vector<1x16x64xf32>
    %6 = arith.mulf %0, %5 : vector<1x16x64xf32>
    %7 = arith.select %3, %0, %6 : vector<1x16x64xi1>, vector<1x16x64xf32>
    %cst_4 = arith.constant 0.000000e+00 : f32
    %8 = vector.broadcast %cst_4 : f32 to vector<1x1x64xf32>
    %c0_5 = arith.constant 0 : index
    %c0_6 = arith.constant 0 : index
    %c0_7 = arith.constant 0 : index
    %9 = vector.load %arg6[%c0_5, %c0_6, %c0_7] : memref<1x18x64xf32, #tpu.memory_space<vmem>>, vector<1x1x64xf32>
    tpu.vector_store %arg6[%c0_5, %c0_6, %c0_7], %8 {strides = array<i32>} : memref<1x18x64xf32, #tpu.memory_space<vmem>>, vector<1x1x64xf32>,
    %c0_8 = arith.constant 0 : index
    %c17 = arith.constant 17 : index
    %c0_9 = arith.constant 0 : index
    %10 = vector.load %arg6[%c0_8, %c17, %c0_9] : memref<1x18x64xf32, #tpu.memory_space<vmem>>, vector<1x1x64xf32>
    tpu.vector_store %arg6[%c0_8, %c17, %c0_9], %8 {strides = array<i32>} : memref<1x18x64xf32, #tpu.memory_space<vmem>>, vector<1x1x64xf32>,
    %c0_10 = arith.constant 0 : index
    %c1 = arith.constant 1 : index
    %c0_11 = arith.constant 0 : index
    %11 = vector.load %arg6[%c0_10, %c1, %c0_11] : memref<1x18x64xf32, #tpu.memory_space<vmem>>, vector<1x16x64xf32>
    tpu.vector_store %arg6[%c0_10, %c1, %c0_11], %7 {strides = array<i32>} : memref<1x18x64xf32, #tpu.memory_space<vmem>>, vector<1x16x64xf32>,
    %cst_12 = arith.constant 0.000000e+00 : f32
    %12 = vector.broadcast %cst_12 : f32 to vector<16x128xf32>
    %c0_13 = arith.constant 0 : index
    %c0_14 = arith.constant 0 : index
    %c0_15 = arith.constant 0 : index
    %13 = vector.load %arg6[%c0_13, %c0_14, %c0_15] : memref<1x18x64xf32, #tpu.memory_space<vmem>>, vector<1x16x64xf32>
    %14 = vector.shape_cast %13 : vector<1x16x64xf32> to vector<16x64xf32>
    %c0_16 = arith.constant 0 : index
    %c0_17 = arith.constant 0 : index
    %c0_18 = arith.constant 0 : index
    %15 = vector.load %arg3[%c0_16, %c0_17, %c0_18] : memref<3x64x128xf32, #tpu.memory_space<vmem>>, vector<1x64x128xf32>
    %16 = vector.shape_cast %15 : vector<1x64x128xf32> to vector<64x128xf32>
    %cst_19 = arith.constant dense<0.000000e+00> : vector<16x128xf32>
    %17 = tpu.matmul %14, %16, %cst_19 {dimension_numbers = #tpu.dot_dimension_numbers<[1], [0], [0], [1], [0, 0, 1, 1], [], []>} : vector<16x64xf32>, vector<64x128xf32>, vector<16x128xf32> -> vector<16x128xf32>
    %18 = arith.addf %12, %17 : vector<16x128xf32>
    %c0_20 = arith.constant 0 : index
    %c1_21 = arith.constant 1 : index
    %c0_22 = arith.constant 0 : index
    %19 = vector.load %arg6[%c0_20, %c1_21, %c0_22] : memref<1x18x64xf32, #tpu.memory_space<vmem>>, vector<1x16x64xf32>
    %20 = vector.shape_cast %19 : vector<1x16x64xf32> to vector<16x64xf32>
    %c1_23 = arith.constant 1 : index
    %c0_24 = arith.constant 0 : index
    %c0_25 = arith.constant 0 : index
    %21 = vector.load %arg3[%c1_23, %c0_24, %c0_25] : memref<3x64x128xf32, #tpu.memory_space<vmem>>, vector<1x64x128xf32>
    %22 = vector.shape_cast %21 : vector<1x64x128xf32> to vector<64x128xf32>
    %cst_26 = arith.constant dense<0.000000e+00> : vector<16x128xf32>
    %23 = tpu.matmul %20, %22, %cst_26 {dimension_numbers = #tpu.dot_dimension_numbers<[1], [0], [0], [1], [0, 0, 1, 1], [], []>} : vector<16x64xf32>, vector<64x128xf32>, vector<16x128xf32> -> vector<16x128xf32>
    %24 = arith.addf %18, %23 : vector<16x128xf32>
    %c0_27 = arith.constant 0 : index
    %c2 = arith.constant 2 : index
    %c0_28 = arith.constant 0 : index
    %25 = vector.load %arg6[%c0_27, %c2, %c0_28] : memref<1x18x64xf32, #tpu.memory_space<vmem>>, vector<1x16x64xf32>
    %26 = vector.shape_cast %25 : vector<1x16x64xf32> to vector<16x64xf32>
    %c2_29 = arith.constant 2 : index
    %c0_30 = arith.constant 0 : index
    %c0_31 = arith.constant 0 : index
    %27 = vector.load %arg3[%c2_29, %c0_30, %c0_31] : memref<3x64x128xf32, #tpu.memory_space<vmem>>, vector<1x64x128xf32>
    %28 = vector.shape_cast %27 : vector<1x64x128xf32> to vector<64x128xf32>
    %cst_32 = arith.constant dense<0.000000e+00> : vector<16x128xf32>
    %29 = tpu.matmul %26, %28, %cst_32 {dimension_numbers = #tpu.dot_dimension_numbers<[1], [0], [0], [1], [0, 0, 1, 1], [], []>} : vector<16x64xf32>, vector<64x128xf32>, vector<16x128xf32> -> vector<16x128xf32>
    %30 = arith.addf %24, %29 : vector<16x128xf32>
    %c0_33 = arith.constant 0 : index
    %c0_34 = arith.constant 0 : index
    %31 = vector.load %arg4[%c0_33, %c0_34] : memref<1x128xf32, #tpu.memory_space<vmem>>, vector<1x128xf32>
    %32 = vector.broadcast %31 : vector<1x128xf32> to vector<16x128xf32>
    %33 = arith.addf %30, %32 : vector<16x128xf32>
    %34 = vector.shape_cast %33 : vector<16x128xf32> to vector<1x16x128xf32>
    %c0_35 = arith.constant 0 : index
    %c0_36 = arith.constant 0 : index
    %c0_37 = arith.constant 0 : index
    %35 = vector.load %arg5[%c0_35, %c0_36, %c0_37] : memref<1x16x128xf32, #tpu.memory_space<vmem>>, vector<1x16x128xf32>
    tpu.vector_store %arg5[%c0_35, %c0_36, %c0_37], %34 {strides = array<i32>} : memref<1x16x128xf32, #tpu.memory_space<vmem>>, vector<1x16x128xf32>,
    return
  }
  func.func @transform_0(%arg0: i32) -> (i32, i32, i32) {
    %c0_i32 = arith.constant 0 : i32
    %c0_i32_0 = arith.constant 0 : i32
    %c0_i32_1 = arith.constant 0 : i32
    return %arg0, %c0_i32, %c0_i32_0 : i32, i32, i32
  }
  func.func @transform_1(%arg0: i32) -> (i32, i32) {
    %c0_i32 = arith.constant 0 : i32
    %c0_i32_0 = arith.constant 0 : i32
    %c0_i32_1 = arith.constant 0 : i32
    return %c0_i32, %c0_i32_0 : i32, i32
  }
  func.func @transform_2(%arg0: i32) -> (i32, i32, i32) {
    %c0_i32 = arith.constant 0 : i32
    %c0_i32_0 = arith.constant 0 : i32
    %c0_i32_1 = arith.constant 0 : i32
    %c0_i32_2 = arith.constant 0 : i32
    return %c0_i32, %c0_i32_0, %c0_i32_1 : i32, i32, i32
  }
  func.func @transform_3(%arg0: i32) -> (i32, i32) {
    %c0_i32 = arith.constant 0 : i32
    %c0_i32_0 = arith.constant 0 : i32
    %c0_i32_1 = arith.constant 0 : i32
    return %c0_i32, %c0_i32_0 : i32, i32
  }
  func.func @transform_4(%arg0: i32) -> (i32, i32, i32) {
    %c0_i32 = arith.constant 0 : i32
    %c0_i32_0 = arith.constant 0 : i32
    %c0_i32_1 = arith.constant 0 : i32
    return %arg0, %c0_i32, %c0_i32_0 : i32, i32, i32
  }
}

</mosaic_0001>

<bundles_post_ra>
// kernel: tpu_custom_call.1
= control target key start
LH: loop header
LB: loop body
LE: loop exit
PB: predicated region body
PF: predicated region fallthrough
CT: control target
= control target key end

     0   :  { %9 = vsyncpa [#allocation4], 0  ;;  %s1254_s0 = inlined_call_operand.hbm [shape: f32[2,16,64], index: 0, kind: input, shape index: {}]   ;;  %s1255_s1 = inlined_call_operand.vmem [shape: f32[1,64], index: 1, kind: input, shape index: {}]   ;;  %s1256_s2 = inlined_call_operand.hbm [shape: f32[3,64,128], index: 2, kind: input, shape index: {}]   ;;  %s1257_s3 = inlined_call_operand.vmem [shape: f32[1,128], index: 3, kind: input, shape index: {}]   ;;  %s1258_s4 = inlined_call_operand.hbm [shape: f32[2,16,128], index: 4, kind: output, shape index: {}]  }
   0x1   :  { %11 = vsyncpa [#allocation4 + $0x1], 0 }
   0x2   :  { %12 = vsyncpa [#allocation7], 0 }
   0x3   :  { %13 = vsyncpa [#allocation5], 0 }
   0x4   :  { %15 = vsyncpa [#allocation5 + $0x1], 0  ;;  %s1027_s15 = smov 0   ;;  %s1029_s16 = smov 0  }
   0x5   :  { %s1031_s17 = smov 0   ;;  %s1033_s18 = smov 0  }
   0x6 LB: > { %s1048_s19 = sadd.s32 4294967295, %s992_s18   ;;  %s637_s20 = sadd.s32 4294967294, %s992_s18   ;;  %s992_s18 = sphi %s1033_s18, %s1278_s18   ;;  %s988_s17 = sphi %s1031_s17, %s1277_s17   ;;  %s984_s16 = sphi %s1029_s16, %s1276_s16   ;;  %s980_s15 = sphi %s1027_s15, %s1275_s15  }
   0x7   : > { %p41_p0 = scmp.ne.s32.totalorder %s984_s16, %s980_s15  ;;  %p1259_p1 = scmp.eq.s32.totalorder %s1048_s19, 0 }
   0x8   : > { %p134_p3 = scmp.eq.s32.totalorder %s637_s20, 1  ;;  %p638_p5 = scmp.ge.s32.totalorder %s992_s18, 1 }
   0x9   : > { %p1057_p4 = por %p1259_p1, %p41_p0  ;;  %p141_p7 = scmp.lt.s32.totalorder %s992_s18, 3 }
   0xa   : > { %p1062_p6 = por %p134_p3, %p41_p0  ;;  %s994_s24 = smov [#allocation6]  }
   0xb   : > { %s1262_s21 = scalar_select %p1057_p4, 1, 0 }
   0xc   : > { %s1263_s22 = scalar_select %p1062_p6, 1, 0 }
   0xd   : > { %p1067_p8 = pnand %p638_p5, %p141_p7  ;;  %s156_s25 = sshll.u32 %s994_s24, 4  ;;  %s1071_s25 = int_to_ptr.vmem [resolvable:$true] %s156_s25 }
   0xe   : > { %s1083_s27 = sadd.s32 1, %s992_s18   ;;  %s28_s28 = sadd.s32 1, %s988_s17 }
   0xf   : > { %s1264_s23 = scalar_select %p1067_p8, 1, 0 }
  0x10   : > { %p810_p9 = pneg %p1067_p8  ;;  %s25_s29 = ssub.s32 %s992_s18, %s1083_s27 }
  0x11   : > { %s864_s6 = scalar_lea.hbm %s1256_s2, 3072 }
  0x12   : > { %p1078_p11 = pnand %p810_p9, %p1259_p1  ;;  %p865_p12 = scmp.ne.s32.totalorder %s1256_s2, %s864_s6 }
  0x13   : > { %p871_p5 = scmp.lt.u32.totalorder %s864_s6, %s1256_s2 }
  0x14   : > { %p866_p13 = pneg %p1078_p11 }
  0x16   : > { %p867_p0 = pnand %p866_p13, %p865_p12 }
  0x18   : > { %p868_p3 = pneg %p867_p0 }
  0x1a   : > { %p873_p7 = pnand %p871_p5, %p868_p3 }
  0x1c   : > { %876 = shalt.err (!%p873_p7)
}
  0x1d   : > { %s877_s11 = scalar_lea.vmem %s1071_s25, 3072  ;;  %p885_p2 = scmp.lt.s32.totalorder %s1071_s25, %s1071_s25 }
  0x1e   : > { %p878_p9 = scmp.ne.s32.totalorder %s1071_s25, %s877_s11  ;;  %p886_p6 = scmp.lt.s32.totalorder %s877_s11, %s877_s11 }
  0x20   : > { %p880_p10 = pnand %p878_p9, %p866_p13  ;;  %p887_p4 = por %p886_p6, %p885_p2 }
  0x22   : > { %p881_p1 = pneg %p880_p10 }
  0x24   : > { %p888_p8 = pnand %p887_p4, %p881_p1 }
  0x26   : > { %891 = shalt.err (!%p888_p8)
}
  0x27   : > { %s995_s12 = smov 128   ;;  %s996_s13 = smov 8  }
  0x28   : > { %813 = dma.hbm_to_vmem [thread:$0]  (!%p1078_p11), %s1256_s2, 3072, %s1071_s25, [#allocation7], %s995_s12, %s995_s12, %s996_s13  }
  0x29   : > { %p26_p1 = scmp.eq.s32.totalorder %s25_s29, 0  ;;  %p35_p2 = scmp.ne.s32.totalorder %s988_s17, %s984_s16 }
  0x2a   : > { %p36_p4 = scmp.eq.s32.totalorder %s992_s18, 0  ;;  %p823_p6 = scmp.lt.s32.totalorder %s992_s18, 2 }
  0x2b   : > { %s1117_s24 = scalar_select %p26_p1, %s988_s17, %s28_s28  }
  0x2c   : > { %p37_p8 = por %p36_p4, %p35_p2  ;;  %p1266_p10 = scmp.eq.s32.totalorder %s1048_s19, 1 }
  0x2d   : > { %s173_s26 = sand.u32 1, %s988_s17   ;;  %s661_s5 = sshll.u32 %s992_s18, 8 }
  0x2e   : > { %p1121_p12 = por %p1266_p10, %p35_p2  ;;  %s641_s6 = sshll.u32 %s173_s26, 4 }
  0x2f   : > { %s1130_s9 = scalar_lea.hbm %s1254_s0, %s661_s5  ;;  %s177_s25 = scalar_lea.vmem [#allocation3], %s641_s6 }
  0x30   : > { %s184_s28 = sshll.u32 %s177_s25, 4  ;;  %p1132_p11 = pnand %p823_p6, %p37_p8  ;;  %s1136_s28 = int_to_ptr.vmem [resolvable:$true] %s184_s28 }
  0x31   : > { %s1138_s10 = scalar_lea.sflag [#allocation4], %s173_s26  ;;  %s892_s11 = scalar_lea.hbm %s1130_s9, 256 }
  0x32   : > { %p893_p13 = scmp.ne.s32.totalorder %s1130_s9, %s892_s11  ;;  %p894_p0 = pneg %p1132_p11 }
  0x33   : > { %s897_s5 = scalar_lea.hbm %s1254_s0, 512  ;;  %p898_p7 = scmp.lt.u32.totalorder %s1130_s9, %s1254_s0 }
  0x34   : > { %p895_p3 = pnand %p894_p0, %p893_p13  ;;  %p899_p9 = scmp.lt.u32.totalorder %s897_s5, %s892_s11 }
  0x35   : > { %p901_p2 = scmp.lt.u32.totalorder %s892_s11, %s1130_s9 }
  0x36   : > { %p896_p5 = pneg %p895_p3  ;;  %p900_p1 = por %p899_p9, %p898_p7 }
  0x38   : > { %p902_p4 = por %p901_p2, %p900_p1 }
  0x3a   : > { %p903_p6 = pnand %p902_p4, %p896_p5 }
  0x3c   : > { %906 = shalt.err (!%p903_p6)
}
  0x3d   : > { %s907_s26 = scalar_lea.vmem %s1136_s28, 256  ;;  %s997_s8 = smov [#allocation3]  }
  0x3e   : > { %p908_p8 = scmp.ne.s32.totalorder %s1136_s28, %s907_s26  ;;  %s912_s25 = sshll.u32 %s997_s8, 4  ;;  %s913_s25 = int_to_ptr.vmem [resolvable:$false] %s912_s25 }
  0x3f   : > { %s914_s14 = scalar_lea.vmem %s913_s25, 512  ;;  %p915_p3 = scmp.lt.s32.totalorder %s1136_s28, %s913_s25 }
  0x40   : > { %p910_p10 = pnand %p908_p8, %p894_p0  ;;  %p916_p7 = scmp.lt.s32.totalorder %s914_s14, %s907_s26 }
  0x42   : > { %p911_p13 = pneg %p910_p10  ;;  %p917_p9 = por %p916_p7, %p915_p3 }
  0x44   : > { %p918_p1 = pnand %p917_p9, %p911_p13 }
  0x46   : > { %921 = shalt.err (!%p918_p1)
}
  0x47   : > { %817 = dma.hbm_to_vmem [thread:$0]  (!%p1132_p11), %s1130_s9, 256, %s1136_s28, %s1138_s10, %s995_s12, %s995_s12, %s996_s13  }
  0x48   : > { %p1269_p0 = scmp.ne.s32.totalorder %s1264_s23, 0 }
  0x49   : > { %s1172_s11 = sand.u32 (!%p1269_p0), 1, %s984_s16   ;;  %p1270_p5 = scmp.ne.s32.totalorder (!%p1269_p0), %s1262_s21, 0 }
  0x4a   : > { %196 = sbr.rel (%p1269_p0) target bundleno = 352 (0x160), region = 36  ;;  %s645_s20 = sshll.u32 (!%p1269_p0), %s1172_s11, 4 }
  0x4b   : > { %s199_s5 = scalar_lea.sflag (!%p1269_p0), [#allocation4], %s1172_s11  ;;  %s202_s29 = scalar_lea.vmem (!%p1269_p0), [#allocation3], %s645_s20 }
  0x51   : > { %967 = dma.done.wait (%p1270_p5), %s199_s5, 256  }
  0x52   : > { %969 = vsyncadd (%p1270_p5), %s199_s5, 4294967040  ;;  %p1271_p11 = scmp.eq.s32.totalorder %s1048_s19, 0 }
  0x54   : > { %971 = dma.done.wait (%p1271_p11), [#allocation7], 3072   ;;  %p1272_p2 = pmov %p1271_p11 }
  0x55   : > { %vm246_vm0 = vcmask 516096   ;;  %v998_v0 = vmov 0.0   ;;  %v254_v1 = vld [vmem:[#allocation6] sm:$0xff]  ;;  %v255_v2 = vld [vmem:[#allocation6 + $0x8] sm:$0xff]  ;;  %v256_v3 = vld [vmem:[#allocation6 + $0x10] sm:$0xff]  ;;  %vm249_vm3 = vcmask 523264  }
  0x56   : > { %973 = vsyncadd (%p1272_p2), [#allocation7], 4294964224  ;;  %247 = vst.msk [vmem:[#allocation2] sm:$0x1] %vm246_vm0, %v998_v0  ;;  %v766_v4 = vpack.c.bf16 %v255_v2, %v254_v1  ;;  %v257_v5 = vld [vmem:[#allocation6 + $0x18] sm:$0xff]  ;;  %v258_v7 = vld [vmem:[#allocation6 + $0x20] sm:$0xff] }
  0x57   : > { %248 = vst.msk [vmem:[#allocation2 + $0x11] sm:$0x1] %vm246_vm0, %v998_v0  ;;  %v770_v6 = vpack.c.bf16 %v257_v5, %v256_v3  ;;  %v259_v8 = vld [vmem:[#allocation6 + $0x28] sm:$0xff]  ;;  %v265_v9 = vld [vmem:[#allocation6 + $0x40] sm:$0xff]  ;;  %v260_v16 = vld [vmem:[#allocation6 + $0x30] sm:$0xff]  ;;  %s230_s12 = scalar_lea.vmem [#allocation8], %s645_s20 }
  0x58   : > { %767 = vmatprep.subr.bf16.mxu0 %v766_v4  ;;  %v266_v10 = vld [vmem:[#allocation6 + $0x48] sm:$0xff]  ;;  %v231_v11 = vld [vmem:[%s202_s29] sm:$0xff]  ;;  %v774_v15 = vpack.c.bf16 %v259_v8, %v258_v7  ;;  %v268_v20 = vld [vmem:[#allocation6 + $0x58] sm:$0xff]  ;;  %s554_s13 = sshll.u32 %s230_s12, 4  ;;  %s662_s10 = sshll.u32 %s1048_s19, 8  ;;  %s1205_s13 = int_to_ptr.vmem [resolvable:$true] %s554_s13 }
  0x59   : > { %v232_v12 = vld [vmem:[%s202_s29 + $0x8] sm:$0xff]  ;;  %769 = vmatpush3.bf16.msra.mxu0 %v766_v4  ;;  %v750_v13 = vpack.c.bf16 %v266_v10, %v265_v9  ;;  %vm234_vm1 = vcmp.gt.f32.partialorder %v231_v11, 0.0  ;;  %v267_v19 = vld [vmem:[#allocation6 + $0x50] sm:$0xff]  ;;  %v269_v23 = vld [vmem:[#allocation6 + $0x60] sm:$0xff]  ;;  %s1210_s26 = scalar_lea.hbm %s1258_s4, %s662_s10  ;;  %s541_s8 = scalar_lea.sflag [#allocation5], %s1172_s11 }
  0x5a   : > { %v648_v14 = vld [vmem:[%s1255_s1] ss:$0 sm:$0xff]  ;;  %vm235_vm2 = vcmp.gt.f32.partialorder %v232_v12, 0.0  ;;  %771 = vmatprep.subr.bf16.mxu0 %v770_v6  ;;  %v261_v21 = vld [vmem:[#allocation6 + $0x38] sm:$0xff]  ;;  %v754_v22 = vpack.c.bf16 %v268_v20, %v267_v19  ;;  %v438_v29 = vld [vmem:[#allocation6 + $0x80] sm:$0xff]  ;;  %s922_s25 = scalar_lea.vmem %s1205_s13, 256 }
  0x5b   : > { %v242_v17 = vmul.f32 %v648_v14, %v231_v11  ;;  %v243_v18 = vmul.f32 %v648_v14, %v232_v12  ;;  %751 = vmatprep.subr.bf16.mxu1 %v750_v13  ;;  %v270_v24 = vld [vmem:[#allocation6 + $0x68] sm:$0xff]  ;;  %v778_v28 = vpack.c.bf16 %v261_v21, %v260_v16  ;;  %v271_v31 = vld [vmem:[#allocation6 + $0x70] sm:$0xff]  ;;  %v272_v32 = vld [vmem:[#allocation6 + $0x78] sm:$0xff]  ;;  %p923_p4 = scmp.ne.s32.totalorder %s1205_s13, %s922_s25  ;;  %s999_s19 = smov [#allocation8]  }
  0x5c   : > { %753 = vmatpush3.bf16.msra.mxu1 %v750_v13  ;;  %v758_v27 = vpack.c.bf16 %v270_v24, %v269_v23  ;;  %v439_v30 = vld [vmem:[#allocation6 + $0x88] sm:$0xff]  ;;  %v762_v34 = vpack.c.bf16 %v272_v32, %v271_v31  ;;  %v440_v35 = vld [vmem:[#allocation6 + $0x90] sm:$0xff]  ;;  %v441_v36 = vld [vmem:[#allocation6 + $0x98] sm:$0xff]  ;;  %s926_s14 = sshll.u32 %s999_s19, 4  ;;  %s927_s14 = int_to_ptr.vmem [resolvable:$false] %s926_s14 }
  0x5d   : > { %v244_v25 = vsel %vm234_vm1, %v231_v11, %v242_v17  ;;  %v245_v26 = vsel %vm235_vm2, %v232_v12, %v243_v18  ;;  %773 = vmatpush3.bf16.msra.mxu0 %v770_v6  ;;  %755 = vmatprep.subr.bf16.mxu1 %v754_v22  ;;  %v782_v33 = vpack.c.bf16 %v439_v30, %v438_v29  ;;  %v442_v42 = vld [vmem:[#allocation6 + $0xa0] sm:$0xff]  ;;  %v443_v43 = vld [vmem:[#allocation6 + $0xa8] sm:$0xff]  ;;  %v444_v46 = vld [vmem:[#allocation6 + $0xb0] sm:$0xff]  ;;  %p924_p6 = pnand %p923_p4, %p1121_p12  ;;  %s928_s20 = scalar_lea.vmem %s927_s14, 512 }
  0x5e   : > { %250 = vst.msk [vmem:[#allocation2 + $0x1] sm:$0xff] %vm249_vm3, %v244_v25  ;;  %251 = vst.msk [vmem:[#allocation2 + $0x9] sm:$0xff] %vm249_vm3, %v245_v26  ;;  %775 = vmatprep.subr.bf16.mxu0 %v774_v15  ;;  %v786_v40 = vpack.c.bf16 %v441_v36, %v440_v35  ;;  %v790_v45 = vpack.c.bf16 %v443_v43, %v442_v42  ;;  %v445_v47 = vld [vmem:[#allocation6 + $0xb8] sm:$0xff]  ;;  %v655_v53 = vld [vmem:[%s1257_s3] ss:$0 sm:$0xff]  ;;  %p929_p10 = scmp.lt.s32.totalorder %s1205_s13, %s927_s14  ;;  %p930_p13 = scmp.lt.s32.totalorder %s928_s20, %s922_s25 }
  0x5f   : > { %v794_v48 = vpack.c.bf16 %v445_v47, %v444_v46  ;;  %p925_p8 = pneg %p924_p6 }
  0x60   : > { %757 = vmatpush3.bf16.msra.mxu1 %v754_v22  ;;  %p931_p3 = por %p930_p13, %p929_p10 }
  0x61   : > { %777 = vmatpush3.bf16.msra.mxu0 %v774_v15  ;;  %759 = vmatprep.subr.bf16.mxu1 %v758_v27 }
  0x62   : > { %779 = vmatprep.subr.bf16.mxu0 %v778_v28  ;;  %p932_p7 = pnand %p931_p3, %p925_p8 }
  0x64   : > { %761 = vmatpush3.bf16.msra.mxu1 %v758_v27 }
  0x65   : > { %v252_v37 = vld [vmem:[#allocation2] sm:$0xff]  ;;  %781 = vmatpush3.bf16.msra.mxu0 %v778_v28  ;;  %v253_v39 = vld [vmem:[#allocation2 + $0x8] sm:$0xff]  ;;  %763 = vmatprep.subr.bf16.mxu1 %v762_v34 }
  0x66   : > { %v262_v38 = vld [vmem:[#allocation2 + $0x1] sm:$0xff]  ;;  %728 = vmatprep.mubr.msk.f32.mxu0 %vm249_vm3, %v252_v37  ;;  %783 = vmatprep.subr.bf16.mxu0 %v782_v33  ;;  %v263_v44 = vld [vmem:[#allocation2 + $0x9] sm:$0xff] }
  0x67   : > { %v435_v41 = vld [vmem:[#allocation2 + $0x2] sm:$0xff]  ;;  %709 = vmatprep.mubr.msk.f32.mxu1 %vm249_vm3, %v262_v38  ;;  %v436_v49 = vld [vmem:[#allocation2 + $0xa] sm:$0xff] }
  0x68   : > { %729 = vmatmul.mubr.msk.f32.vlgmr.msra.gmra.mrb[0].mxu0 %vm249_vm3, %v253_v39  ;;  %765 = vmatpush3.bf16.msra.mxu1 %v762_v34 }
  0x69   : > { %785 = vmatpush3.bf16.msra.mxu0 %v782_v33  ;;  %747 = vmatprep.mubr.msk.f32.mxu0 %vm249_vm3, %v435_v41 }
  0x6a   : > { %787 = vmatprep.subr.bf16.mxu0 %v786_v40 }
  0x6b   : > { %710 = vmatmul.mubr.msk.f32.vlgmr.msra.gmra.mrb[0].mxu1 %vm249_vm3, %v263_v44 }
  0x6d   : > { %789 = vmatpush3.bf16.msra.mxu0 %v786_v40 }
  0x6e   : > { %791 = vmatprep.subr.bf16.mxu0 %v790_v45 }
  0x71   : > { %793 = vmatpush3.bf16.msra.mxu0 %v790_v45 }
  0x72   : > { %795 = vmatprep.subr.bf16.mxu0 %v794_v48 }
  0x75   : > { %797 = vmatpush3.bf16.msra.mxu0 %v794_v48 }
  0x78   : > { %748 = vmatmul.mubr.msk.f32.vlgmr.msra.gmra.mrb[0].mxu0 %vm249_vm3, %v436_v49 }
 0x13e   : > { %v711_v50 = vpop.f32.mrb[0].mxu1 }
 0x13f   : > { %v345_v51 = vpop.f32.mrb[1].mxu1 }
 0x14b   : > { %v749_v52 = vpop.f32.mrb[0].mxu0 }
 0x14c   : > { %v798_v54 = vadd.f32 %v749_v52, %v711_v50  ;;  %v518_v55 = vpop.f32.mrb[1].mxu0 }
 0x14d   : > { %v799_v56 = vadd.f32 %v518_v55, %v345_v51 }
 0x14e   : > { %v537_v57 = vadd.f32 %v798_v54, %v655_v53 }
 0x14f   : > { %v536_v58 = vadd.f32 %v799_v56, %v655_v53 }
 0x150   : > { %539 = vst [vmem:[%s230_s12 + $0x8] sm:$0xff] %v537_v57 }
 0x151   : > { %538 = vst [vmem:[%s230_s12] sm:$0xff] %v536_v58 }
 0x152   : > { %935 = shalt.err (!%p932_p7)
}
 0x153   : > { %s936_s5 = scalar_lea.hbm %s1210_s26, 256  ;;  %s940_s23 = scalar_lea.hbm %s1258_s4, 512 }
 0x154   : > { %p937_p9 = scmp.ne.s32.totalorder %s1210_s26, %s936_s5  ;;  %p941_p5 = scmp.lt.u32.totalorder %s1210_s26, %s1258_s4 }
 0x155   : > { %p942_p11 = scmp.lt.u32.totalorder %s940_s23, %s936_s5  ;;  %p944_p4 = scmp.lt.u32.totalorder %s936_s5, %s1210_s26 }
 0x156   : > { %p938_p1 = pnand %p937_p9, %p1121_p12 }
 0x157   : > { %p943_p2 = por %p942_p11, %p941_p5 }
 0x158   : > { %p939_p0 = pneg %p938_p1 }
 0x159   : > { %p945_p6 = por %p944_p4, %p943_p2 }
 0x15b   : > { %p946_p8 = pnand %p945_p6, %p939_p0 }
 0x15d   : > { %949 = shalt.err (!%p946_p8)
}
 0x15e   : > { %s1000_s28 = smov 128   ;;  %s1001_s10 = smov 8  }
 0x15f   : > { %808 = dma.vmem_to_hbm [thread:$0]  (%p1121_p12), %s1205_s13, 256, %s1210_s26, %s541_s8, %s1000_s28, %s1000_s28, %s1001_s10  }
 0x160 PF: > { %s569_s6 = sand.u32 1, %s980_s15   ;;  %p1273_p10 = scmp.ne.s32.totalorder %s1263_s22, 0 }
 0x161   : > { %p1274_p13 = scmp.ge.s32.totalorder %s992_s18, 2  ;;  %s570_s7 = scalar_lea.sflag [#allocation5], %s569_s6 }
 0x163   : > { %p819_p3 = pnand %p1274_p13, %p1273_p10 }
 0x165   : > { %975 = dma.done.wait (!%p819_p3), %s570_s7, 256  }
 0x166   : > { %977 = vsyncadd (!%p819_p3), %s570_s7, 4294967040  ;;  %p18_p7 = scmp.ge.s32.totalorder %s1083_s27, 4   ;;  %s1275_s15 = smov %s984_s16 }
 0x167   : > { %s1276_s16 = smov %s988_s17  ;;  %s1277_s17 = smov %s1117_s24 }
 0x168   : > { %s1278_s18 = smov %s1083_s27  ;;  %20 = sbr.rel (!%p18_p7) target bundleno = 6 (0x6), region = 87 }
 0x16f   :  { %575 = vsyncpa [#allocation4], 1 }
 0x170   :  { %577 = vsyncpa [#allocation4 + $0x1], 1 }
 0x171   :  { %578 = vsyncpa [#allocation7], 1 }
 0x172   :  { %579 = vsyncpa [#allocation5], 1 }
 0x173   :  { %581 = vsyncpa [#allocation5 + $0x1], 1 }

</bundles_post_ra>
